<compile_context>
chip_gen: v6e
topology: v6e:2x2x1
jax: 0.10.0
libtpu: 0.0.40
codegen_flags: <defaults>
</compile_context>

<pallas_src>
import jax
import jax.numpy as jnp
from jax.experimental import pallas as pl
from jax.experimental.pallas import tpu as pltpu

NUM_CLASSES = 3
FEAT_DIM = 384
H1_DIM = 256
H2_DIM = 128
OUT_PAD = 128           # final layer padded from 3 to 128 lanes (unmasked vst)
LN_EPS = 1e-5           # PyTorch nn.LayerNorm default
TB_DEFAULT = 1024       # batch tile; working set ~4 MiB, fits all generations


def _round_up(x, m):
    return ((x + m - 1) // m) * m


def classifier_kernel(x_ref, w1_ref, b1_ref, w2_ref, b2_ref, w3_ref, b3_ref, o_ref):
    # x_ref: (TB, 384) fp32 features (cast to bf16 here, not in the wrapper);
    # weights bf16, biases fp32.
    x = x_ref[...].astype(jnp.bfloat16)

    # Linear(384 -> 256): bf16 MXU matmul, fp32 accumulation, fp32 bias.
    h = jnp.dot(x, w1_ref[...], preferred_element_type=jnp.float32) + b1_ref[...]

    # LayerNorm(256): single-pass biased stats in fp32 (PyTorch semantics).
    # The affine (gamma, beta) is folded into w2/b2 at parameter-prep time.
    mean = jnp.mean(h, axis=-1, keepdims=True)
    msq = jnp.mean(h * h, axis=-1, keepdims=True)
    var = msq - mean * mean
    inv = jax.lax.rsqrt(var + LN_EPS)
    hn = (h - mean) * inv

    # Linear(256 -> 128) + ReLU (gamma/beta already folded into w2/b2).
    h2 = jnp.dot(hn.astype(jnp.bfloat16), w2_ref[...],
                 preferred_element_type=jnp.float32) + b2_ref[...]
    h2 = jnp.maximum(h2, 0.0)

    # Dropout -> identity in eval mode.
    # TODO(synk): training-mode dropout mask (pltpu.prng_*) not implemented.

    # Linear(128 -> 128 padded); real logits are the first NUM_CLASSES lanes.
    out = jnp.dot(h2.astype(jnp.bfloat16), w3_ref[...],
                  preferred_element_type=jnp.float32) + b3_ref[...]
    o_ref[...] = out.astype(o_ref.dtype)   # bf16, lane-dense 128-wide store


def prepare_classifier_params(params):
    """Fold LayerNorm affine into w2/b2, pad the final layer to 128 output
    lanes, and cast matmul weights to bf16 (biases stay fp32)."""
    w1, b1, gamma, beta, w2, b2, w3, b3 = params
    # y = norm(h)*gamma + beta ; y @ w2 + b2 == norm(h) @ (gamma[:,None]*w2) + (beta@w2 + b2)
    w2f = w2 * gamma.reshape(-1, 1)
    b2f = beta.reshape(1, -1) @ w2 + b2
    w3p = jnp.zeros((H2_DIM, OUT_PAD), jnp.float32).at[:, :NUM_CLASSES].set(w3)
    b3p = jnp.zeros((1, OUT_PAD), jnp.float32).at[:, :NUM_CLASSES].set(b3)
    return (w1.astype(jnp.bfloat16), b1,
            w2f.astype(jnp.bfloat16), b2f,
            w3p.astype(jnp.bfloat16), b3p)


def classifier_pallas(feats, prepped, tb=TB_DEFAULT):
    """feats: (B, 384) float32.  Returns (B, NUM_CLASSES) float32."""
    B = feats.shape[0]
    w1, b1, w2, b2, w3, b3 = prepped

    # Batch tile: cap at TB_DEFAULT, keep >= 2 tiles when B allows (v7x has
    # 2 TensorCores), multiple of 16 for bf16 output sublane packing.
    tb = max(16, min(tb, _round_up(pl.cdiv(B, 2), 16)))
    grid = (pl.cdiv(B, tb),)   # ragged last tile handled by masked writeback

    def resident(shape):
        # Weight/bias blocks: same block every grid step -> stays in VMEM.
        return pl.BlockSpec(shape, lambda i: (0, 0))

    out = pl.pallas_call(
        classifier_kernel,
        out_shape=jax.ShapeDtypeStruct((B, OUT_PAD), jnp.bfloat16),
        grid=grid,
        in_specs=[
            pl.BlockSpec((tb, FEAT_DIM), lambda i: (i, 0)),   # streamed per tile
            resident(w1.shape), resident(b1.shape),
            resident(w2.shape), resident(b2.shape),
            resident(w3.shape), resident(b3.shape),
        ],
        out_specs=pl.BlockSpec((tb, OUT_PAD), lambda i: (i, 0)),
        compiler_params=pltpu.CompilerParams(
            dimension_semantics=("parallel",),          # shard tiles across TCs (v7x)
            vmem_limit_bytes=32 * 1024 * 1024,
        ),
    )(feats, w1, b1, w2, b2, w3, b3)

    # Drop padded output lanes and cast logits back to fp32 outside the kernel.
    return out[:, :NUM_CLASSES].astype(jnp.float32)


def init_params(key):
    """Deterministic parameter init matching the classifier shapes (fp32)."""
    ks = jax.random.split(key, 6)
    # Linear weights stored as (in, out) so the kernel does x @ W.
    w1 = jax.random.normal(ks[0], (FEAT_DIM, H1_DIM), jnp.float32) * (1.0 / FEAT_DIM ** 0.5)
    b1 = jax.random.normal(ks[1], (1, H1_DIM), jnp.float32) * 0.01
    gamma = jnp.ones((1, H1_DIM), jnp.float32)
    beta = jnp.zeros((1, H1_DIM), jnp.float32)
    w2 = jax.random.normal(ks[2], (H1_DIM, H2_DIM), jnp.float32) * (1.0 / H1_DIM ** 0.5)
    b2 = jax.random.normal(ks[3], (1, H2_DIM), jnp.float32) * 0.01
    w3 = jax.random.normal(ks[4], (H2_DIM, NUM_CLASSES), jnp.float32) * (1.0 / H2_DIM ** 0.5)
    b3 = jax.random.normal(ks[5], (1, NUM_CLASSES), jnp.float32) * 0.01
    return (w1, b1, gamma, beta, w2, b2, w3, b3)


def dino_stub(key, x_nchw):
    """Plain-JAX stand-in for the DINO backbone: GAP over HW + Linear(C -> 384).
    TODO(synk): replace with a real ViT-S/16 forward pass if needed."""
    B, C, H, W = x_nchw.shape
    pooled = jnp.mean(x_nchw, axis=(2, 3))  # (B, C)
    w = jax.random.normal(key, (C, FEAT_DIM), jnp.float32) * (1.0 / C ** 0.5)
    return pooled @ w  # (B, 384) fp32 — fed to the kernel without a wrapper cast


def custom_dino_norm_model_forward(x_nchw, backbone_key, prepped):
    feats = dino_stub(backbone_key, x_nchw)        # x = self.dino_model(x)
    return classifier_pallas(feats, prepped)       # x = self.classifier(x)


def _reference(x_nchw, backbone_key, params):
    """Pure-fp32 JAX reference with original (unfolded, unpadded) params."""
    w1, b1, g, beta, w2, b2, w3, b3 = params
    h = dino_stub(backbone_key, x_nchw)
    h = h @ w1 + b1
    mean = jnp.mean(h, axis=-1, keepdims=True)
    var = jnp.mean((h - mean) ** 2, axis=-1, keepdims=True)
    h = (h - mean) / jnp.sqrt(var + LN_EPS) * g + beta
    h = jnp.maximum(h @ w2 + b2, 0.0)
    return h @ w3 + b3


if __name__ == "__main__":
    key = jax.random.PRNGKey(0)
    k_img, k_backbone, k_params = jax.random.split(key, 3)

    # Small image input, PyTorch NCHW convention.
    x = jax.random.normal(k_img, (2, 3, 16, 16), jnp.float32)

    params = init_params(k_params)
    prepped = prepare_classifier_params(params)

    out = custom_dino_norm_model_forward(x, k_backbone, prepped)
    out = jax.block_until_ready(out)

    ref = _reference(x, k_backbone, params)
    assert out.shape == (2, NUM_CLASSES)
    # bf16 matmul inputs / bf16 output store (fp32 accumulation) vs pure-fp32
    # reference -> bf16 tolerance.
    assert jnp.allclose(out, ref, atol=5e-2, rtol=5e-2), "mismatch vs reference"

    print("KERNEL_OK")
</pallas_src>

<mosaic_0001>
module attributes {stable_mosaic.version = 11 : i64} {
  func.func @classifier_kernel(%arg0: i32, %arg1: memref<16x384xf32, #tpu.memory_space<vmem>>, %arg2: memref<384x256xbf16, #tpu.memory_space<vmem>>, %arg3: memref<1x256xf32, #tpu.memory_space<vmem>>, %arg4: memref<256x128xbf16, #tpu.memory_space<vmem>>, %arg5: memref<1x128xf32, #tpu.memory_space<vmem>>, %arg6: memref<128x128xbf16, #tpu.memory_space<vmem>>, %arg7: memref<1x128xf32, #tpu.memory_space<vmem>>, %arg8: memref<16x128xbf16, #tpu.memory_space<vmem>>) attributes {dimension_semantics = [#tpu.dimension_semantics<parallel>], iteration_bounds = array<i64: 1>, scalar_prefetch = 0 : i64, scratch_operands = 0 : i64, tpu.core_type = #tpu.core_type<tc>, window_params = [{transform_indices = @transform_0, window_bounds = array<i64: 16, 384>}, {pipeline_mode = #tpu.pipeline_mode<synchronous>, transform_indices = @transform_1, window_bounds = array<i64: 384, 256>}, {pipeline_mode = #tpu.pipeline_mode<synchronous>, transform_indices = @transform_2, window_bounds = array<i64: 1, 256>}, {pipeline_mode = #tpu.pipeline_mode<synchronous>, transform_indices = @transform_3, window_bounds = array<i64: 256, 128>}, {pipeline_mode = #tpu.pipeline_mode<synchronous>, transform_indices = @transform_4, window_bounds = array<i64: 1, 128>}, {pipeline_mode = #tpu.pipeline_mode<synchronous>, transform_indices = @transform_5, window_bounds = array<i64: 128, 128>}, {pipeline_mode = #tpu.pipeline_mode<synchronous>, transform_indices = @transform_6, window_bounds = array<i64: 1, 128>}, {transform_indices = @transform_7, window_bounds = array<i64: 16, 128>}]} {
    %c0 = arith.constant 0 : index
    %c0_0 = arith.constant 0 : index
    %0 = vector.load %arg1[%c0, %c0_0] : memref<16x384xf32, #tpu.memory_space<vmem>>, vector<16x384xf32>
    %1 = arith.truncf %0 : vector<16x384xf32> to vector<16x384xbf16>
    %c0_1 = arith.constant 0 : index
    %c0_2 = arith.constant 0 : index
    %2 = vector.load %arg2[%c0_1, %c0_2] : memref<384x256xbf16, #tpu.memory_space<vmem>>, vector<384x256xbf16>
    %cst = arith.constant dense<0.000000e+00> : vector<16x256xf32>
    %3 = tpu.matmul %1, %2, %cst {dimension_numbers = #tpu.dot_dimension_numbers<[1], [0], [0], [1], [0, 0, 1, 1], [], []>} : vector<16x384xbf16>, vector<384x256xbf16>, vector<16x256xf32> -> vector<16x256xf32>
    %c0_3 = arith.constant 0 : index
    %c0_4 = arith.constant 0 : index
    %4 = vector.load %arg3[%c0_3, %c0_4] : memref<1x256xf32, #tpu.memory_space<vmem>>, vector<1x256xf32>
    %5 = vector.broadcast %4 : vector<1x256xf32> to vector<16x256xf32>
    %6 = arith.addf %3, %5 : vector<16x256xf32>
    %cst_5 = arith.constant dense<0.000000e+00> : vector<16xf32>
    %7 = vector.multi_reduction <add>, %6, %cst_5 [1] : vector<16x256xf32> to vector<16xf32>
    %8 = vector.shape_cast %7 : vector<16xf32> to vector<16x1xf32>
    %cst_6 = arith.constant 2.560000e+02 : f32
    %9 = vector.broadcast %cst_6 : f32 to vector<16x1xf32>
    %10 = arith.divf %8, %9 : vector<16x1xf32>
    %11 = arith.mulf %6, %6 : vector<16x256xf32>
    %cst_7 = arith.constant dense<0.000000e+00> : vector<16xf32>
    %12 = vector.multi_reduction <add>, %11, %cst_7 [1] : vector<16x256xf32> to vector<16xf32>
    %13 = vector.shape_cast %12 : vector<16xf32> to vector<16x1xf32>
    %cst_8 = arith.constant 2.560000e+02 : f32
    %14 = vector.broadcast %cst_8 : f32 to vector<16x1xf32>
    %15 = arith.divf %13, %14 : vector<16x1xf32>
    %16 = arith.mulf %10, %10 : vector<16x1xf32>
    %17 = arith.subf %15, %16 : vector<16x1xf32>
    %cst_9 = arith.constant 9.99999974E-6 : f32
    %18 = vector.broadcast %cst_9 : f32 to vector<16x1xf32>
    %19 = arith.addf %17, %18 : vector<16x1xf32>
    %20 = math.rsqrt %19 : vector<16x1xf32>
    %21 = vector.broadcast %10 : vector<16x1xf32> to vector<16x256xf32>
    %22 = arith.subf %6, %21 : vector<16x256xf32>
    %23 = vector.broadcast %20 : vector<16x1xf32> to vector<16x256xf32>
    %24 = arith.mulf %22, %23 : vector<16x256xf32>
    %25 = arith.truncf %24 : vector<16x256xf32> to vector<16x256xbf16>
    %c0_10 = arith.constant 0 : index
    %c0_11 = arith.constant 0 : index
    %26 = vector.load %arg4[%c0_10, %c0_11] : memref<256x128xbf16, #tpu.memory_space<vmem>>, vector<256x128xbf16>
    %cst_12 = arith.constant dense<0.000000e+00> : vector<16x128xf32>
    %27 = tpu.matmul %25, %26, %cst_12 {dimension_numbers = #tpu.dot_dimension_numbers<[1], [0], [0], [1], [0, 0, 1, 1], [], []>} : vector<16x256xbf16>, vector<256x128xbf16>, vector<16x128xf32> -> vector<16x128xf32>
    %c0_13 = arith.constant 0 : index
    %c0_14 = arith.constant 0 : index
    %28 = vector.load %arg5[%c0_13, %c0_14] : memref<1x128xf32, #tpu.memory_space<vmem>>, vector<1x128xf32>
    %29 = vector.broadcast %28 : vector<1x128xf32> to vector<16x128xf32>
    %30 = arith.addf %27, %29 : vector<16x128xf32>
    %cst_15 = arith.constant 0.000000e+00 : f32
    %31 = vector.broadcast %cst_15 : f32 to vector<16x128xf32>
    %32 = arith.maximumf %30, %31 : vector<16x128xf32>
    %33 = arith.truncf %32 : vector<16x128xf32> to vector<16x128xbf16>
    %c0_16 = arith.constant 0 : index
    %c0_17 = arith.constant 0 : index
    %34 = vector.load %arg6[%c0_16, %c0_17] : memref<128x128xbf16, #tpu.memory_space<vmem>>, vector<128x128xbf16>
    %cst_18 = arith.constant dense<0.000000e+00> : vector<16x128xf32>
    %35 = tpu.matmul %33, %34, %cst_18 {dimension_numbers = #tpu.dot_dimension_numbers<[1], [0], [0], [1], [0, 0, 1, 1], [], []>} : vector<16x128xbf16>, vector<128x128xbf16>, vector<16x128xf32> -> vector<16x128xf32>
    %c0_19 = arith.constant 0 : index
    %c0_20 = arith.constant 0 : index
    %36 = vector.load %arg7[%c0_19, %c0_20] : memref<1x128xf32, #tpu.memory_space<vmem>>, vector<1x128xf32>
    %37 = vector.broadcast %36 : vector<1x128xf32> to vector<16x128xf32>
    %38 = arith.addf %35, %37 : vector<16x128xf32>
    %39 = arith.truncf %38 : vector<16x128xf32> to vector<16x128xbf16>
    %c0_21 = arith.constant 0 : index
    %c0_22 = arith.constant 0 : index
    %40 = vector.load %arg8[%c0_21, %c0_22] : memref<16x128xbf16, #tpu.memory_space<vmem>>, vector<16x128xbf16>
    tpu.vector_store %arg8[%c0_21, %c0_22], %39 {strides = array<i32>} : memref<16x128xbf16, #tpu.memory_space<vmem>>, vector<16x128xbf16>,
    return
  }
  func.func @transform_0(%arg0: i32) -> (i32, i32) {
    %c0_i32 = arith.constant 0 : i32
    %c0_i32_0 = arith.constant 0 : i32
    return %arg0, %c0_i32 : i32, i32
  }
  func.func @transform_1(%arg0: i32) -> (i32, i32) {
    %c0_i32 = arith.constant 0 : i32
    %c0_i32_0 = arith.constant 0 : i32
    %c0_i32_1 = arith.constant 0 : i32
    return %c0_i32, %c0_i32_0 : i32, i32
  }
  func.func @transform_2(%arg0: i32) -> (i32, i32) {
    %c0_i32 = arith.constant 0 : i32
    %c0_i32_0 = arith.constant 0 : i32
    %c0_i32_1 = arith.constant 0 : i32
    return %c0_i32, %c0_i32_0 : i32, i32
  }
  func.func @transform_3(%arg0: i32) -> (i32, i32) {
    %c0_i32 = arith.constant 0 : i32
    %c0_i32_0 = arith.constant 0 : i32
    %c0_i32_1 = arith.constant 0 : i32
    return %c0_i32, %c0_i32_0 : i32, i32
  }
  func.func @transform_4(%arg0: i32) -> (i32, i32) {
    %c0_i32 = arith.constant 0 : i32
    %c0_i32_0 = arith.constant 0 : i32
    %c0_i32_1 = arith.constant 0 : i32
    return %c0_i32, %c0_i32_0 : i32, i32
  }
  func.func @transform_5(%arg0: i32) -> (i32, i32) {
    %c0_i32 = arith.constant 0 : i32
    %c0_i32_0 = arith.constant 0 : i32
    %c0_i32_1 = arith.constant 0 : i32
    return %c0_i32, %c0_i32_0 : i32, i32
  }
  func.func @transform_6(%arg0: i32) -> (i32, i32) {
    %c0_i32 = arith.constant 0 : i32
    %c0_i32_0 = arith.constant 0 : i32
    %c0_i32_1 = arith.constant 0 : i32
    return %c0_i32, %c0_i32_0 : i32, i32
  }
  func.func @transform_7(%arg0: i32) -> (i32, i32) {
    %c0_i32 = arith.constant 0 : i32
    %c0_i32_0 = arith.constant 0 : i32
    return %arg0, %c0_i32 : i32, i32
  }
}

</mosaic_0001>

<bundles_post_ra>
// kernel: tpu_custom_call.1
= control target key start
LH: loop header
LB: loop body
LE: loop exit
PB: predicated region body
PF: predicated region fallthrough
CT: control target
= control target key end

     0   :  { %12 = vsyncpa [#allocation3], 0  ;;  %s1460_s0 = inlined_call_operand.hbm [shape: f32[2,384], index: 0, kind: input, shape index: {}]   ;;  %s1461_s1 = inlined_call_operand.hbm [shape: bf16[384,256], index: 1, kind: input, shape index: {}]   ;;  %s1462_s2 = inlined_call_operand.vmem [shape: f32[1,256], index: 2, kind: input, shape index: {}]   ;;  %s1463_s3 = inlined_call_operand.hbm [shape: bf16[256,128], index: 3, kind: input, shape index: {}]   ;;  %s1464_s4 = inlined_call_operand.vmem [shape: f32[1,128], index: 4, kind: input, shape index: {}]   ;;  %s1465_s5 = inlined_call_operand.hbm [shape: bf16[128,128], index: 5, kind: input, shape index: {}]   ;;  %s1466_s6 = inlined_call_operand.vmem [shape: f32[1,128], index: 6, kind: input, shape index: {}]   ;;  %s1467_s7 = inlined_call_operand.hbm [shape: bf16[2,128], index: 7, kind: output, shape index: {}]  }
   0x1   :  { %13 = vsyncpa [#allocation6], 0 }
   0x2   :  { %14 = vsyncpa [#allocation9], 0 }
   0x3   :  { %15 = vsyncpa [#allocation4], 0 }
   0x4   :  { %20 = vsyncadd [#allocation3], 672  ;;  %s1348_s24 = smov [#allocation5]  }
   0x5   :  { %s33_s25 = sshll.u32 %s1348_s24, 4  ;;  %s34_s25 = int_to_ptr.vmem [resolvable:$true] %s33_s25 }
   0x6   :  { %s1248_s26 = scalar_lea.vmem %s34_s25, 6144  ;;  %p1253_p1 = scmp.lt.s32.totalorder %s34_s25, %s34_s25 }
   0x7   :  { %p1249_p0 = scmp.ne.s32.totalorder %s34_s25, %s1248_s26  ;;  %p1254_p2 = scmp.lt.s32.totalorder %s1248_s26, %s1248_s26 }
   0x9   :  { %p1255_p3 = por %p1254_p2, %p1253_p1 }
   0xb   :  { %p1256_p4 = pnand %p1255_p3, %p1249_p0 }
   0xd   :  { %1259 = shalt.err (!%p1256_p4)
}
   0xe   :  { %s1349_s27 = smov 128   ;;  %s1350_s28 = smov 8  }
   0xf   :  { %39 = dma.hbm_to_vmem [thread:$0]  %s1461_s1, 6144, %s34_s25, [#allocation6], %s1349_s27, %s1349_s27, %s1350_s28  }
  0x10   :  { %s1351_s8 = smov [#allocation2]  }
  0x11   :  { %s21_s9 = sshll.u32 %s1351_s8, 4  ;;  %s22_s9 = int_to_ptr.vmem [resolvable:$true] %s21_s9 }
  0x12   :  { %s1268_s10 = scalar_lea.vmem %s22_s9, 96  ;;  %s1272_s11 = scalar_lea.vmem %s22_s9, 768 }
  0x13   :  { %p1269_p5 = scmp.ne.s32.totalorder %s22_s9, %s1268_s10  ;;  %p1273_p6 = scmp.lt.s32.totalorder %s22_s9, %s22_s9 }
  0x14   :  { %p1274_p7 = scmp.lt.s32.totalorder %s1272_s11, %s1268_s10 }
  0x16   :  { %p1275_p8 = por %p1274_p7, %p1273_p6 }
  0x18   :  { %p1276_p9 = pnand %p1275_p8, %p1269_p5 }
  0x1a   :  { %1279 = shalt.err (!%p1276_p9)
}
  0x1b   :  { %s1352_s12 = smov 96   ;;  %s1353_s13 = smov 6  }
  0x1c   :  { %27 = dma.hbm_to_vmem [thread:$0]  %s1460_s0, 96, %s22_s9, [#allocation3], %s1352_s12, %s1352_s12, %s1353_s13  }
  0x1d   :  { %s1354_s16 = smov [#allocation7]  }
  0x1e   :  { %s47_s17 = sshll.u32 %s1354_s16, 4  ;;  %s48_s17 = int_to_ptr.vmem [resolvable:$true] %s47_s17 }
  0x1f   :  { %s1288_s1 = scalar_lea.vmem %s48_s17, 2048  ;;  %p1293_p11 = scmp.lt.s32.totalorder %s48_s17, %s48_s17 }
  0x20   :  { %p1289_p10 = scmp.ne.s32.totalorder %s48_s17, %s1288_s1  ;;  %p1294_p12 = scmp.lt.s32.totalorder %s1288_s1, %s1288_s1 }
  0x22   :  { %p1295_p13 = por %p1294_p12, %p1293_p11 }
  0x24   :  { %p1296_p0 = pnand %p1295_p13, %p1289_p10 }
  0x26   :  { %1299 = shalt.err (!%p1296_p0)
}
  0x27   :  { %s1355_s18 = smov 64   ;;  %s1356_s19 = smov 4  }
  0x28   :  { %53 = dma.hbm_to_vmem [thread:$0]  %s1463_s3, 2048, %s48_s17, [#allocation6], %s1355_s18, %s1355_s18, %s1356_s19  }
  0x29   :  { %s1357_s22 = smov [#allocation8]  }
  0x2a   :  { %s61_s23 = sshll.u32 %s1357_s22, 4  ;;  %s62_s23 = int_to_ptr.vmem [resolvable:$true] %s61_s23 }
  0x2b   :  { %s1308_s0 = scalar_lea.vmem %s62_s23, 1024  ;;  %p1313_p2 = scmp.lt.s32.totalorder %s62_s23, %s62_s23 }
  0x2c   :  { %p1309_p1 = scmp.ne.s32.totalorder %s62_s23, %s1308_s0  ;;  %p1314_p3 = scmp.lt.s32.totalorder %s1308_s0, %s1308_s0 }
  0x2e   :  { %p1315_p4 = por %p1314_p3, %p1313_p2 }
  0x30   :  { %p1316_p5 = pnand %p1315_p4, %p1309_p1 }
  0x32   :  { %1319 = shalt.err (!%p1316_p5)
}
  0x33   :  { %67 = dma.hbm_to_vmem [thread:$0]  %s1465_s5, 1024, %s62_s23, [#allocation9], %s1355_s18, %s1355_s18, %s1356_s19  }
  0x34   :  { %1340 = dma.done.wait [#allocation3], 768  }
  0x35   :  { %1341 = vsyncadd [#allocation3], 4294966528 }
  0x36   :  { %1342 = dma.done.wait [#allocation6], 8192  }
  0x37   :  { %1343 = vsyncadd [#allocation6], 4294959104 }
  0x38   :  { %1344 = dma.done.wait [#allocation9], 1024  }
  0x39   :  { %1345 = vsyncadd [#allocation9], 4294966272  ;;  %v1358_v0 = vmov 0   ;;  %v1128_v1 = vld [vmem:[#allocation5 + $0x74] ss:$8 sps:$4 sm:$0xff]   ;;  %v106_v27 = vlaneseq  ;;  %vm1361_vm0 = vmmov 0  }
  0x3a   :  { %553 = vmatprep.mubr.bf16.mxu1 %v1358_v0  ;;  %v1130_v2 = vld [vmem:[#allocation5 + $0x70] ss:$8 sps:$4 sm:$0xff]   ;;  %478 = vmatprep.subr.bf16.mxu0 %v1128_v1  ;;  %v1131_v3 = vld [vmem:[#allocation5 + $0x64] ss:$8 sps:$4 sm:$0xff]   ;;  %v1133_v4 = vld [vmem:[#allocation5 + $0x60] ss:$8 sps:$4 sm:$0xff]  }
  0x3b   :  { %479 = vmatpush1.bf16.msra.mxu0 %v1130_v2  ;;  %v1134_v5 = vld [vmem:[#allocation5 + $0x54] ss:$8 sps:$4 sm:$0xff]   ;;  %v1136_v6 = vld [vmem:[#allocation5 + $0x50] ss:$8 sps:$4 sm:$0xff]   ;;  %v1137_v7 = vld [vmem:[#allocation5 + $0x44] ss:$8 sps:$4 sm:$0xff]  }
  0x3c   :  { %480 = vmatprep.subr.bf16.mxu0 %v1131_v3  ;;  %v1139_v8 = vld [vmem:[#allocation5 + $0x40] ss:$8 sps:$4 sm:$0xff]   ;;  %v1151_v9 = vld [vmem:[#allocation5 + $0x174] ss:$8 sps:$4 sm:$0xff]   ;;  %v1154_v10 = vld [vmem:[#allocation5 + $0x170] ss:$8 sps:$4 sm:$0xff]  }
  0x3d   :  { %v1140_v11 = vld [vmem:[#allocation5 + $0x34] ss:$8 sps:$4 sm:$0xff]   ;;  %521 = vmatprep.subr.bf16.mxu1 %v1151_v9  ;;  %v1157_v12 = vld [vmem:[#allocation5 + $0x164] ss:$8 sps:$4 sm:$0xff]   ;;  %v1160_v13 = vld [vmem:[#allocation5 + $0x160] ss:$8 sps:$4 sm:$0xff]  }
  0x3e   :  { %522 = vmatpush1.bf16.msra.mxu1 %v1154_v10  ;;  %v1142_v14 = vld [vmem:[#allocation5 + $0x30] ss:$8 sps:$4 sm:$0xff]   ;;  %v1143_v15 = vld [vmem:[#allocation5 + $0x24] ss:$8 sps:$4 sm:$0xff]   ;;  %v1163_v16 = vld [vmem:[#allocation5 + $0x154] ss:$8 sps:$4 sm:$0xff]  }
  0x3f   :  { %481 = vmatpush1.bf16.msra.mxu0 %v1133_v4  ;;  %523 = vmatprep.subr.bf16.mxu1 %v1157_v12  ;;  %v1166_v17 = vld [vmem:[#allocation5 + $0x150] ss:$8 sps:$4 sm:$0xff]   ;;  %v1145_v18 = vld [vmem:[#allocation5 + $0x20] ss:$8 sps:$4 sm:$0xff]   ;;  %v1169_v19 = vld [vmem:[#allocation5 + $0x144] ss:$8 sps:$4 sm:$0xff]  }
  0x40   :  { %482 = vmatprep.subr.bf16.mxu0 %v1134_v5  ;;  %v1146_v20 = vld [vmem:[#allocation5 + $0x14] ss:$8 sps:$4 sm:$0xff]   ;;  %v1148_v21 = vld [vmem:[#allocation5 + $0x10] ss:$8 sps:$4 sm:$0xff]   ;;  %v1172_v22 = vld [vmem:[#allocation5 + $0x140] ss:$8 sps:$4 sm:$0xff]  }
  0x41   :  { %v1175_v23 = vld [vmem:[#allocation5 + $0x134] ss:$8 sps:$4 sm:$0xff]   ;;  %v1149_v24 = vld [vmem:[#allocation5 + $0x4] ss:$8 sps:$4 sm:$0xff]   ;;  %v1359_v25 = vmov 1983009808  }
  0x42   :  { %524 = vmatpush1.bf16.msra.mxu1 %v1160_v13  ;;  %v104_v26 = vunpack.c.l.s4 %v1359_v25  ;;  %v1178_v28 = vld [vmem:[#allocation5 + $0x130] ss:$8 sps:$4 sm:$0xff]   ;;  %v1153_v29 = vld [vmem:[#allocation5] ss:$8 sps:$4 sm:$0xff]   ;;  %v1181_v30 = vld [vmem:[#allocation5 + $0x124] ss:$8 sps:$4 sm:$0xff]  }
  0x43   :  { %483 = vmatpush1.bf16.msra.mxu0 %v1136_v6  ;;  %525 = vmatprep.subr.bf16.mxu1 %v1163_v16  ;;  %v1155_v31 = vld [vmem:[#allocation5 + $0xf4] ss:$8 sps:$4 sm:$0xff]   ;;  %v1418_v33 = vshrl.u32 %v106_v27, 7  ;;  %v1159_v34 = vld [vmem:[#allocation5 + $0xf0] ss:$8 sps:$4 sm:$0xff]  }
  0x44   :  { %484 = vmatprep.subr.bf16.mxu0 %v1137_v7  ;;  %v105_v32 = vunpack.c.0.s8 %v104_v26  ;;  %v1161_v35 = vld [vmem:[#allocation5 + $0xe4] ss:$8 sps:$4 sm:$0xff]   ;;  %v1184_v36 = vld [vmem:[#allocation5 + $0x120] ss:$8 sps:$4 sm:$0xff]   ;;  %v1187_v37 = vld [vmem:[#allocation5 + $0x114] ss:$8 sps:$4 sm:$0xff]  }
  0x45   :  { %v1190_v38 = vld [vmem:[#allocation5 + $0x110] ss:$8 sps:$4 sm:$0xff]   ;;  %v1165_v40 = vld [vmem:[#allocation5 + $0xe0] ss:$8 sps:$4 sm:$0xff]   ;;  %v1193_v41 = vld [vmem:[#allocation5 + $0x104] ss:$8 sps:$4 sm:$0xff]  }
  0x46   :  { %526 = vmatpush1.bf16.msra.mxu1 %v1166_v17  ;;  %v108_v39 = vsub.s32 %v105_v32, %v1418_v33  ;;  %v1167_v42 = vld [vmem:[#allocation5 + $0xd4] ss:$8 sps:$4 sm:$0xff]   ;;  %v1201_v44 = vld [vmem:[#allocation2 + $0x10] ss:$6 sps:$4 sm:$0x33]   ;;  %v230_v17 = vsub.s32 0, %v1418_v33 }
  0x47   :  { %485 = vmatpush1.bf16.msra.mxu0 %v1139_v8  ;;  %527 = vmatprep.subr.bf16.mxu1 %v1169_v19  ;;  %v1199_v43 = vld [vmem:[#allocation2 + $0x4] ss:$6 sps:$4 sm:$0x33]   ;;  %v1203_v45 = vld [vmem:[#allocation2 + $0x1c] ss:$6 sps:$4 sm:$0x33]  }
  0x48   :  { %486 = vmatprep.subr.bf16.mxu0 %v1140_v11  ;;  %v1196_v46 = vld [vmem:[#allocation5 + $0x100] ss:$8 sps:$4 sm:$0xff]   ;;  %v116_v47 = vrot.slane %v1199_v43, %v108_v39  ;;  %v1205_v48 = vld [vmem:[#allocation2 + $0x28] ss:$6 sps:$4 sm:$0x33]   ;;  %v130_v50 = vrot.slane %v1201_v44, %v108_v39  ;;  %v151_v51 = vrot.slane %v1203_v45, %v108_v39  ;;  %v234_v19 = vsub.s32 1, %v1418_v33 }
  0x49   :  { %v1171_v49 = vld [vmem:[#allocation5 + $0xd0] ss:$8 sps:$4 sm:$0xff]   ;;  %v1209_v53 = vld [vmem:[#allocation2 + $0xc] ss:$6 sps:$4 sm:$0xff]   ;;  %v165_v56 = vrot.slane %v1205_v48, %v108_v39 }
  0x4a   :  { %528 = vmatpush1.bf16.msra.mxu1 %v1172_v22  ;;  %v1208_v52 = vld [vmem:[#allocation2] ss:$6 sps:$4 sm:$0xff]   ;;  %v1173_v55 = vld [vmem:[#allocation5 + $0xc4] ss:$8 sps:$4 sm:$0xff]   ;;  %v133_v58 = vcombine.low %v116_v47, %v130_v50  ;;  %v123_v60 = vrot.slane %v1209_v53, %v108_v39  ;;  %v1177_v0 = vld [vmem:[#allocation5 + $0xc0] ss:$8 sps:$4 sm:$0xff]  }
  0x4b   :  { %487 = vmatpush1.bf16.msra.mxu0 %v1142_v14  ;;  %529 = vmatprep.subr.bf16.mxu1 %v1175_v23  ;;  %v1210_v54 = vld [vmem:[#allocation2 + $0x18] ss:$6 sps:$4 sm:$0xff]   ;;  %v1211_v57 = vld [vmem:[#allocation2 + $0x24] ss:$6 sps:$4 sm:$0xff]   ;;  %v109_v59 = vrot.slane %v1208_v52, %v108_v39  ;;  %v168_v61 = vcombine.low %v151_v51, %v165_v56  ;;  %v1218_v52 = vld [vmem:[#allocation7 + $0x60] sm:$0xff]  }
  0x4c   :  { %488 = vmatprep.subr.bf16.mxu0 %v1143_v15  ;;  %v144_v62 = vrot.slane %v1210_v54, %v108_v39  ;;  %v158_v63 = vrot.slane %v1211_v57, %v108_v39  ;;  %v1179_v2 = vld [vmem:[#allocation5 + $0xb4] ss:$8 sps:$4 sm:$0xff]   ;;  %v1183_v6 = vld [vmem:[#allocation5 + $0xb0] ss:$8 sps:$4 sm:$0xff]   ;;  %v1185_v7 = vld [vmem:[#allocation5 + $0xa4] ss:$8 sps:$4 sm:$0xff]  }
  0x4d   :  { %v132_v1 = vcombine.high %v109_v59, %v123_v60  ;;  %v177_v3 = vpack.c.bf16 %v168_v61, %v133_v58  ;;  %v1189_v8 = vld [vmem:[#allocation5 + $0xa0] ss:$8 sps:$4 sm:$0xff]   ;;  %v1191_v9 = vld [vmem:[#allocation5 + $0x94] ss:$8 sps:$4 sm:$0xff]   ;;  %v1195_v10 = vld [vmem:[#allocation5 + $0x90] ss:$8 sps:$4 sm:$0xff]   ;;  %v131_v12 = vcombine.low %v109_v59, %v123_v60 }
  0x4e   :  { %530 = vmatpush1.bf16.msra.mxu1 %v1178_v28  ;;  %v167_v4 = vcombine.high %v144_v62, %v158_v63  ;;  %v1197_v11 = vld [vmem:[#allocation5 + $0x84] ss:$8 sps:$4 sm:$0xff]   ;;  %v166_v13 = vcombine.low %v144_v62, %v158_v63  ;;  %v1207_v14 = vld [vmem:[#allocation5 + $0x80] ss:$8 sps:$4 sm:$0xff]   ;;  %v1212_v16 = vld [vmem:[#allocation7 + $0x78] sm:$0xff]   ;;  %v1360_v63 = vmov 0.0  }
  0x4f   :  { %489 = vmatpush1.bf16.msra.mxu0 %v1145_v18  ;;  %531 = vmatprep.subr.bf16.mxu1 %v1181_v30  ;;  %v226_v18 = vld [vmem:[%s1462_s2] sm:$0x3]  ;;  %v1213_v47 = vld [vmem:[#allocation7 + $0x38] sm:$0xff]   ;;  %v1216_v50 = vld [vmem:[#allocation7 + $0x68] sm:$0xff]  }
  0x50   :  { %490 = vmatprep.subr.bf16.mxu0 %v1146_v20  ;;  %v176_v5 = vpack.c.bf16 %v167_v4, %v132_v1  ;;  %v175_v15 = vpack.c.bf16 %v166_v13, %v131_v12  ;;  %v235_v22 = vrot.slane %v226_v18, %v234_v19  ;;  %v1214_v48 = vld [vmem:[#allocation7 + $0x70] sm:$0xff]   ;;  %v1217_v51 = vld [vmem:[#allocation7 + $0x28] sm:$0xff]   ;;  %v1219_v53 = vld [vmem:[#allocation7 + $0x20] sm:$0xff]  }
  0x51   :  { %v1220_v54 = vld [vmem:[#allocation7 + $0x58] sm:$0xff]   ;;  %v1222_v56 = vld [vmem:[#allocation7 + $0x50] sm:$0xff]   ;;  %v1224_v58 = vld [vmem:[#allocation7 + $0x48] sm:$0xff]  }
  0x52   :  { %532 = vmatpush1.bf16.msra.mxu1 %v1184_v36  ;;  %510 = vmatprep.mubr.bf16.mxu0 %v176_v5  ;;  %v1223_v57 = vld [vmem:[#allocation7 + $0x10] sm:$0xff]   ;;  %v1225_v59 = vld [vmem:[#allocation7 + $0x8] sm:$0xff]   ;;  %v1226_v60 = vld [vmem:[#allocation7 + $0x40] sm:$0xff]  }
  0x53   :  { %491 = vmatpush1.bf16.msra.mxu0 %v1148_v21  ;;  %533 = vmatprep.subr.bf16.mxu1 %v1187_v37  ;;  %v231_v21 = vrot.slane %v226_v18, %v230_v17  ;;  %v1227_v61 = vld [vmem:[#allocation7] sm:$0xff]   ;;  %v1228_v62 = vld [vmem:[#allocation8 + $0x38] sm:$0xff]   ;;  %v1230_v1 = vld [vmem:[#allocation8 + $0x28] sm:$0xff]  }
  0x54   :  { %492 = vmatprep.subr.bf16.mxu0 %v1149_v24 }
  0x56   :  { %534 = vmatpush1.bf16.msra.mxu1 %v1190_v38 }
  0x57   :  { %493 = vmatpush1.bf16.msra.mxu0 %v1153_v29  ;;  %535 = vmatprep.subr.bf16.mxu1 %v1193_v41 }
  0x58   :  { %494 = vmatprep.subr.bf16.mxu0 %v1155_v31 }
  0x5a   :  { %536 = vmatpush1.bf16.msra.mxu1 %v1196_v46 }
  0x5b   :  { %495 = vmatpush2.bf16.msra.mxu0 %v1159_v34  ;;  %1059 = vmatprep.subr.bf16.mxu1 %v1212_v16 }
  0x5c   :  { %496 = vmatprep.subr.bf16.mxu0 %v1161_v35 }
  0x5d   :  { %554 = vmatmul.mubr.bf16.vlgmr.msra.gmra.mxu1 %v177_v3 }
  0x5e   :  { %1060 = vmatpush3.bf16.msra.mxu1 %v1213_v47 }
  0x5f   :  { %497 = vmatpush2.bf16.msra.mxu0 %v1165_v40  ;;  %1061 = vmatprep.subr.bf16.mxu1 %v1214_v48 }
  0x60   :  { %498 = vmatprep.subr.bf16.mxu0 %v1167_v42 }
  0x63   :  { %499 = vmatpush2.bf16.msra.mxu0 %v1171_v49  ;;  %v1215_v49 = vld [vmem:[#allocation7 + $0x30] sm:$0xff]  }
  0x64   :  { %500 = vmatprep.subr.bf16.mxu0 %v1173_v55  ;;  %1062 = vmatpush3.bf16.msra.mxu1 %v1215_v49  ;;  %v1221_v55 = vld [vmem:[#allocation7 + $0x18] sm:$0xff]  }
  0x65   :  { %1063 = vmatprep.subr.bf16.mxu1 %v1216_v50  ;;  %v1045_v50 = vld [vmem:[%s1466_s6] ss:$0 sm:$0xff] }
  0x67   :  { %501 = vmatpush2.bf16.msra.mxu0 %v1177_v0  ;;  %v1229_v0 = vld [vmem:[#allocation8 + $0x30] sm:$0xff]  }
  0x68   :  { %502 = vmatprep.subr.bf16.mxu0 %v1179_v2  ;;  %1064 = vmatpush3.bf16.msra.mxu1 %v1217_v51  ;;  %v1231_v2 = vld [vmem:[#allocation8 + $0x20] sm:$0xff]  }
  0x69   :  { %1065 = vmatprep.subr.bf16.mxu1 %v1218_v52 }
  0x6b   :  { %503 = vmatpush2.bf16.msra.mxu0 %v1183_v6 }
  0x6c   :  { %504 = vmatprep.subr.bf16.mxu0 %v1185_v7  ;;  %1066 = vmatpush3.bf16.msra.mxu1 %v1219_v53 }
  0x6d   :  { %1067 = vmatprep.subr.bf16.mxu1 %v1220_v54 }
  0x6f   :  { %505 = vmatpush2.bf16.msra.mxu0 %v1189_v8 }
  0x70   :  { %506 = vmatprep.subr.bf16.mxu0 %v1191_v9  ;;  %1068 = vmatpush3.bf16.msra.mxu1 %v1221_v55 }
  0x71   :  { %1069 = vmatprep.subr.bf16.mxu1 %v1222_v56 }
  0x73   :  { %507 = vmatpush2.bf16.msra.mxu0 %v1195_v10 }
  0x74   :  { %508 = vmatprep.subr.bf16.mxu0 %v1197_v11  ;;  %1070 = vmatpush3.bf16.msra.mxu1 %v1223_v57 }
  0x75   :  { %1071 = vmatprep.subr.bf16.mxu1 %v1224_v58 }
  0x77   :  { %509 = vmatpush2.bf16.msra.mxu0 %v1207_v14 }
  0x78   :  { %1072 = vmatpush3.bf16.msra.mxu1 %v1225_v59  ;;  %1090 = vmatprep.subr.bf16.mxu0 %v1360_v63 }
  0x79   :  { %1073 = vmatprep.subr.bf16.mxu1 %v1226_v60 }
  0x7a   :  { %511 = vmatmul.mubr.bf16.vlgmr.msra.gmra.mxu0 %v175_v15 }
  0x7b   :  { %1091 = vmatpush3.bf16.msra.mxu0 %v1228_v62  ;;  %1106 = vmatprep.mubr.msk.bf16.mxu0 %vm1361_vm0, %v1360_v63 }
  0x7c   :  { %1074 = vmatpush3.bf16.msra.mxu1 %v1227_v61  ;;  %1092 = vmatprep.subr.bf16.mxu0 %v1360_v63 }
  0x7f   :  { %1093 = vmatpush3.bf16.msra.mxu0 %v1229_v0 }
  0x80   :  { %1094 = vmatprep.subr.bf16.mxu0 %v1360_v63 }
  0x83   :  { %1095 = vmatpush3.bf16.msra.mxu0 %v1230_v1 }
  0x84   :  { %1096 = vmatprep.subr.bf16.mxu0 %v1360_v63 }
  0x87   :  { %1097 = vmatpush3.bf16.msra.mxu0 %v1231_v2 }
  0x88   :  { %1098 = vmatprep.subr.bf16.mxu0 %v1360_v63 }
 0x11d   :  { %v555_v20 = vpop.f32.mrf.mxu1 }
 0x11f   :  { %v557_v23 = vpop.f32.mrf.mxu1 }
 0x121   :  { %v559_v29 = vpop.f32.mrf.mxu1 }
 0x123   :  { %v561_v40 = vpop.f32.mrf.mxu1 }
 0x13a   :  { %v512_v24 = vpop.f32.mrf.mxu0 }
 0x13b   :  { %v513_v25 = vadd.f32 %v512_v24, %v231_v21 }
 0x13c   :  { %v514_v26 = vpop.f32.mrf.mxu0 }
 0x13d   :  { %v1426_v27 = vadd.f32 %v555_v20, %v513_v25  ;;  %v515_v28 = vadd.f32 %v514_v26, %v235_v22 }
 0x13e   :  { %v516_v30 = vpop.f32.mrf.mxu0 }
 0x13f   :  { %v1428_v31 = vadd.f32 %v557_v23, %v515_v28  ;;  %v517_v32 = vadd.f32 %v516_v30, %v231_v21  ;;  %v573_v35 = vmul.f32 %v1426_v27, %v1426_v27  ;;  %v1232_v30 = vld [vmem:[#allocation8 + $0x18] sm:$0xff]  }
 0x140   :  { %v518_v34 = vpop.f32.mrf.mxu0  ;;  %1099 = vmatpush3.bf16.msra.mxu0 %v1232_v30 }
 0x141   :  { %v1432_v36 = vadd.f32 %v559_v29, %v517_v32  ;;  %v519_v37 = vadd.f32 %v518_v34, %v235_v22  ;;  %v564_v38 = vadd.f32 %v1428_v31, %v1426_v27  ;;  %v574_v39 = vmul.f32 %v1428_v31, %v1428_v31  ;;  %1100 = vmatprep.subr.bf16.mxu0 %v1360_v63  ;;  %v1233_v32 = vld [vmem:[#allocation8 + $0x10] sm:$0xff]  }
 0x143   :  { %v1438_v41 = vadd.f32 %v561_v40, %v519_v37  ;;  %565 = vadd.xlane.f32.xlu0 %v564_v38  ;;  %v577_v42 = vadd.f32 %v574_v39, %v573_v35  ;;  %v575_v44 = vmul.f32 %v1432_v36, %v1432_v36  ;;  %v1028_v37 = vld [vmem:[%s1464_s4] ss:$0 sm:$0xff] }
 0x144   :  { %1101 = vmatpush3.bf16.msra.mxu0 %v1233_v32 }
 0x145   :  { %578 = vadd.xlane.f32.xlu1 %v577_v42  ;;  %v567_v43 = vadd.f32 %v1438_v41, %v1432_v36  ;;  %v576_v45 = vmul.f32 %v1438_v41, %v1438_v41  ;;  %1102 = vmatprep.subr.bf16.mxu0 %v1360_v63 }
 0x147   :  { %568 = vadd.xlane.f32.xlu0 %v567_v43  ;;  %v580_v46 = vadd.f32 %v576_v45, %v575_v44 }
 0x149   :  { %581 = vadd.xlane.f32.xlu1 %v580_v46  ;;  %v1362_v46 = vmov 1966171168  }
 0x14a   :  { %v898_v47 = vunpack.c.l.s4 %v1362_v46 }
 0x14c   :  { %v899_v49 = vunpack.c.0.s8 %v898_v47 }
 0x14e   :  { %v902_v55 = vsub.s32 %v899_v49, %v1418_v33 }
 0x1cc   :  { %v566_v3 = vpop.xlane.xlu0 %565 }
 0x1cd   :  { %v571_v4 = vmul.f32 0.00390625, %v566_v3 }
 0x1ce   :  { %v579_v5 = vpop.xlane.xlu1 %578 }
 0x1cf   :  { %v583_v6 = vmul.f32 0.00390625, %v579_v5  ;;  %v585_v7 = vmul.f32 %v571_v4, %v571_v4  ;;  %v593_v18 = vsub.f32 %v1426_v27, %v571_v4  ;;  %v594_v19 = vsub.f32 %v1428_v31, %v571_v4  ;;  %v1234_v27 = vld [vmem:[#allocation8 + $0x8] sm:$0xff]   ;;  %v1235_v31 = vld [vmem:[#allocation8] sm:$0xff]  }
 0x1d0   :  { %v569_v8 = vpop.xlane.xlu0 %568  ;;  %1103 = vmatpush3.bf16.msra.mxu0 %v1234_v27 }
 0x1d1   :  { %v587_v9 = vsub.f32 %v583_v6, %v585_v7  ;;  %v572_v10 = vmul.f32 0.00390625, %v569_v8  ;;  %1104 = vmatprep.subr.bf16.mxu0 %v1360_v63 }
 0x1d2   :  { %v582_v11 = vpop.xlane.xlu1 %581 }
 0x1d3   :  { %v584_v12 = vmul.f32 0.00390625, %v582_v11  ;;  %v589_v13 = vadd.f32 1e-05, %v587_v9  ;;  %v586_v14 = vmul.f32 %v572_v10, %v572_v10  ;;  %v595_v20 = vsub.f32 %v1432_v36, %v572_v10 }
 0x1d4   :  { %v596_v21 = vsub.f32 %v1438_v41, %v572_v10  ;;  %1105 = vmatpush3.bf16.msra.mxu0 %v1235_v31 }
 0x1d5   :  { %v588_v15 = vsub.f32 %v584_v12, %v586_v14  ;;  %1236 = vrsqrt.f32 %v589_v13 }
 0x1d7   :  { %v590_v16 = vadd.f32 1e-05, %v588_v15 }
 0x1d9   :  { %1238 = vrsqrt.f32 %v590_v16 }
 0x1e2   :  { %v1237_v17 = vpop.eup %1236 }
 0x1e3   :  { %v598_v23 = vmul.f32 %v1237_v17, %v594_v19  ;;  %v597_v25 = vmul.f32 %v1237_v17, %v593_v18 }
 0x1e6   :  { %v1239_v22 = vpop.eup %1238 }
 0x1e7   :  { %v600_v24 = vmul.f32 %v1239_v22, %v596_v21  ;;  %v599_v26 = vmul.f32 %v1239_v22, %v595_v20 }
 0x1e9   :  { %v602_v28 = vpack.c.bf16 %v600_v24, %v598_v23  ;;  %v601_v29 = vpack.c.bf16 %v599_v26, %v597_v25 }
 0x1eb   :  { %770 = vmatprep.mubr.bf16.mxu1 %v602_v28 }
 0x1ec   :  { %771 = vmatmul.mubr.bf16.vlgmr.msra.gmra.mxu1 %v601_v29 }
 0x2ac   :  { %v1075_v34 = vpop.f32.mrf.mxu1 }
 0x2ae   :  { %v1076_v35 = vpop.f32.mrf.mxu1 }
 0x2af   :  { %v1077_v36 = vadd.f32 %v1076_v35, %v1075_v34 }
 0x2b0   :  { %v1078_v38 = vpop.f32.mrf.mxu1 }
 0x2b1   :  { %v773_v40 = vadd.f32 %v1077_v36, %v1028_v37 }
 0x2b2   :  { %v1079_v39 = vpop.f32.mrf.mxu1 }
 0x2b3   :  { %v1080_v41 = vadd.f32 %v1079_v39, %v1078_v38  ;;  %v779_v43 = vmax.f32 %v773_v40, 0.0 }
 0x2b5   :  { %v776_v42 = vadd.f32 %v1080_v41, %v1028_v37 }
 0x2b7   :  { %v780_v44 = vmax.f32 %v776_v42, 0.0 }
 0x2b9   :  { %v781_v45 = vpack.c.bf16 %v780_v44, %v779_v43 }
 0x2bb   :  { %1107 = vmatmul.mubr.bf16.vlgmr.msra.gmra.mxu0 %v781_v45 }
 0x37b   :  { %v887_v48 = vpop.f32.mrf.mxu0 }
 0x37c   :  { %v888_v53 = vadd.f32 %v1045_v50, %v887_v48 }
 0x37d   :  { %v1108_v51 = vpop.f32.mrf.mxu0 }
 0x37f   :  { %v890_v52 = vpop.f32.mrf.mxu0 }
 0x380   :  { %v891_v54 = vadd.f32 %v1045_v50, %v890_v52 }
 0x381   :  { %v1109_v56 = vpop.f32.mrf.mxu0 }
 0x382   :  { %v894_v57 = vpack.c.bf16 %v891_v54, %v888_v53  ;;  %v1054_v58 = vpack.c.bf16 %v891_v54, %v891_v54 }
 0x384   :  { %v903_v59 = vrot.slane %v894_v57, %v902_v55  ;;  %v910_v60 = vrot.slane %v1054_v58, %v902_v55 }
 0x386   :  { %v911_v61 = vcombine.high %v903_v59, %v903_v59  ;;  %v912_v62 = vcombine.high %v910_v60, %v910_v60  ;;  %v919_v63 = vrot.slane %v903_v59, %v902_v55  ;;  %v926_v0 = vrot.slane %v910_v60, %v902_v55  ;;  %1055 = vst.sshfl [vmem:[#allocation10] sm:$0x1 pattern:$0x73625140] %v903_v59 }
 0x387   :  { %1057 = vst.sshfl [vmem:[#allocation10 + $0x4] sm:$0x1 pattern:$0x73625140] %v910_v60 }
 0x388   :  { %v933_v1 = vrot.slane %v911_v61, %v902_v55  ;;  %v940_v2 = vrot.slane %v912_v62, %v902_v55  ;;  %v941_v3 = vcombine.high %v919_v63, %v919_v63  ;;  %v942_v4 = vcombine.high %v926_v0, %v926_v0  ;;  %1056 = vst.sshfl [vmem:[#allocation10 + $0x1] sm:$0x1 pattern:$0x73625140] %v911_v61 }
 0x389   :  { %1058 = vst.sshfl [vmem:[#allocation10 + $0x5] sm:$0x1 pattern:$0x73625140] %v912_v62 }
 0x38a   :  { %v943_v5 = vcombine.high %v933_v1, %v933_v1  ;;  %v944_v6 = vcombine.high %v940_v2, %v940_v2  ;;  %955 = vst [vmem:[#allocation10 + $0x2] sm:$0x1] %v941_v3  ;;  %959 = vst [vmem:[#allocation10 + $0x6] sm:$0x1] %v942_v4 }
 0x38c   :  { %956 = vst [vmem:[#allocation10 + $0x3] sm:$0x1] %v943_v5  ;;  %960 = vst [vmem:[#allocation10 + $0x7] sm:$0x1] %v944_v6 }
 0x38d   :  { %965 = vsyncadd [#allocation4], 112  ;;  %s1363_s4 = smov [#allocation10]  }
 0x38e   :  { %s966_s6 = sshll.u32 %s1363_s4, 4  ;;  %s967_s6 = int_to_ptr.vmem [resolvable:$true] %s966_s6 }
 0x38f   :  { %s1320_s29 = scalar_lea.vmem %s967_s6, 16  ;;  %s1324_s30 = scalar_lea.vmem %s967_s6, 128 }
 0x390   :  { %p1321_p6 = scmp.ne.s32.totalorder %s967_s6, %s1320_s29  ;;  %p1325_p7 = scmp.lt.s32.totalorder %s967_s6, %s967_s6 }
 0x391   :  { %p1326_p8 = scmp.lt.s32.totalorder %s1324_s30, %s1320_s29 }
 0x393   :  { %p1327_p9 = por %p1326_p8, %p1325_p7 }
 0x395   :  { %p1328_p10 = pnand %p1327_p9, %p1321_p6 }
 0x397   :  { %1331 = shalt.err (!%p1328_p10)
}
 0x398   :  { %s1364_s8 = smov 16   ;;  %s1365_s9 = smov 1  }
 0x399   :  { %972 = dma.vmem_to_hbm [thread:$0]  %s967_s6, 16, %s1467_s7, [#allocation4], %s1364_s8, %s1364_s8, %s1365_s9  }
 0x39a   :  { %1346 = dma.done.wait [#allocation4], 128  }
 0x39b   :  { %1347 = vsyncadd [#allocation4], 4294967168 }
 0x39c   :  { %976 = vsyncpa [#allocation3], 1 }
 0x39d   :  { %977 = vsyncpa [#allocation6], 1 }
 0x39e   :  { %978 = vsyncpa [#allocation9], 1 }
 0x39f   :  { %979 = vsyncpa [#allocation4], 1 }

</bundles_post_ra>
